<compile_context>
chip_gen: v7x
topology: tpu7x:2x2x1
jax: 0.10.0
libtpu: 0.0.40
codegen_flags: <defaults>
</compile_context>

<pallas_src>
import functools

import jax
import jax.numpy as jnp
import numpy as np
from jax.experimental import pallas as pl
from jax.experimental.pallas import tpu as pltpu


def _round_up(x, m):
    return ((x + m - 1) // m) * m


# ---------------------------------------------------------------------------
# Pallas kernel: NB images -> zero-pad in VMEM + KH*KW accumulating matmuls
# ---------------------------------------------------------------------------
def _conv2d_taps_kernel(x_ref, w_ref, b_ref, o_ref, pad_ref, *,
                        NB, H, W, P, KH, KW, Wp, Lp, FLATp):
    """Fused zero-pad + shifted-window matmul + bias for NB NCHW images.

    x_ref   : (NB, Cin, H*W)        flattened NCHW images            (VMEM)
    w_ref   : (KH*KW, Cout, Cin)    weight, tap-major                (VMEM, resident)
    b_ref   : (Cout, 1)             bias                             (VMEM, resident)
    o_ref   : (NB, Cout, Lp)        flat output, Lp = roundup(Ho*Wp) (VMEM)
    pad_ref : (NB, Cin, FLATp)      zero-padded flat images          (VMEM scratch)
    """
    Cin = x_ref.shape[1]

    # ---- materialize zero-padded flat images in VMEM (no HBM jnp.pad) -----
    if P == 0:
        # Interior is fully overwritten; only the read-ahead tail needs zeros.
        if FLATp > H * W:
            for b in range(NB):
                pad_ref[b, :, H * W:FLATp] = jnp.zeros(
                    (Cin, FLATp - H * W), pad_ref.dtype)
        for b in range(NB):
            pad_ref[b, :, 0:H * W] = x_ref[b].astype(pad_ref.dtype)
    else:
        # Full re-zero every step: scratch is per-core and the grid axis is
        # "parallel", so a program_id(0)==0 gate would be wrong on v7x.
        pad_ref[...] = jnp.zeros_like(pad_ref)
        for b in range(NB):
            for h in range(H):
                dst = (h + P) * Wp + P
                pad_ref[b, :, dst:dst + W] = (
                    x_ref[b, :, h * W:(h + 1) * W].astype(pad_ref.dtype))

    bias = b_ref[...].astype(jnp.float32)            # (Cout, 1)

    # ---- KH*KW accumulating MXU matmuls on lane-shifted windows -----------
    # Every tap (ky, kx) of the padded flat image is a contiguous lane window
    # of length Lp starting at ky*Wp + kx; accumulate in f32 vregs.
    for b in range(NB):
        y = None
        for ky in range(KH):
            for kx in range(KW):
                t = ky * KW + kx
                off = ky * Wp + kx
                contrib = jnp.dot(w_ref[t], pad_ref[b, :, off:off + Lp],
                                  preferred_element_type=jnp.float32)
                y = contrib if y is None else y + contrib
        # Lane-dense (Cout, Lp) store, Lp a multiple of 128 -> unmasked vst.
        o_ref[b] = (y + bias).astype(o_ref.dtype)


# ---------------------------------------------------------------------------
# Wrapper: MetaConv2dLayer.forward
# ---------------------------------------------------------------------------
@functools.partial(jax.jit, static_argnames=("stride", "padding", "dilation",
                                             "groups", "nb"))
def meta_conv2d(x, weight, bias=None, *, stride=1, padding=0, dilation=1,
                groups=1, nb=None):
    """Equivalent of F.conv2d(x, weight, bias, stride, padding, dilation, groups).

    x      : (N, Cin, H, W)  float32, NCHW (PyTorch layout)
    weight : (Cout, Cin, KH, KW)
    bias   : (Cout,) or None
    nb     : images per grid step (static); auto-picked if None.
    """
    # TODO(synk): stride>1 / dilation_rate>1 / groups>1 paths of MetaConv2dLayer
    # are not implemented in the Pallas kernel (module defaults are all 1).
    if stride != 1 or dilation != 1 or groups != 1:
        raise NotImplementedError(
            "Pallas MetaConv2d kernel supports stride=dilation=groups=1 only")

    N, Cin, H, W = x.shape
    Cout, Cin_w, KH, KW = weight.shape
    assert Cin_w == Cin, "groups=1 conv requires weight Cin == input Cin"
    P = int(padding)
    Hp, Wp = H + 2 * P, W + 2 * P
    Ho, Wo = Hp - KH + 1, Wp - KW + 1
    assert Ho > 0 and Wo > 0

    L = Ho * Wp                       # flat output length (Wp-Wo garbage cols/row)
    Lp = _round_up(L, 128)            # lane-dense: unmasked output stores
    off_max = (KH - 1) * Wp + (KW - 1)
    FLATp = max(Hp * Wp, off_max + Lp)  # every tap window [off, off+Lp) in-bounds

    # ---- pick NB: amortize per-step overhead, keep grid a multiple of 2 ----
    per_image_bytes = 4 * (Cin * FLATp              # pad scratch
                           + 2 * Cin * H * W        # double-buffered input
                           + 2 * Cout * Lp)         # double-buffered output
    if nb is None:
        cap = max(1, (8 * 1024 * 1024) // per_image_bytes)   # ~8 MiB budget
        nb = 1 if N <= 1 else min(-(-N // 2), cap)            # grid length 2 if it fits
    nb = max(1, min(int(nb), N))
    grid_n = -(-N // nb)
    N_pad = grid_n * nb

    # Tap-major 2-/3-D weight & bias blocks, resident across all grid steps.
    w3d = jnp.transpose(weight, (2, 3, 0, 1)).reshape(
        KH * KW, Cout, Cin).astype(jnp.float32)
    b2d = (jnp.zeros((Cout, 1), jnp.float32) if bias is None
           else bias.reshape(Cout, 1).astype(jnp.float32))
    x_flat = x.reshape(N, Cin, H * W)         # contiguous reshape: no data movement
    if N_pad > N:
        x_flat = jnp.concatenate(
            [x_flat, jnp.zeros((N_pad - N, Cin, H * W), x_flat.dtype)], axis=0)

    kernel = functools.partial(_conv2d_taps_kernel, NB=nb, H=H, W=W, P=P,
                               KH=KH, KW=KW, Wp=Wp, Lp=Lp, FLATp=FLATp)

    # Explicit VMEM budget (don't rely on the per-chip default scoped limit).
    vmem_limit = int(min(100 * 2**20,
                         max(16 * 2**20, 2 * nb * per_image_bytes + (2 << 20))))

    out_flat = pl.pallas_call(
        kernel,
        out_shape=jax.ShapeDtypeStruct((N_pad, Cout, Lp), x.dtype),
        grid_spec=pl.GridSpec(
            grid=(grid_n,),
            in_specs=[
                pl.BlockSpec((nb, Cin, H * W), lambda g: (g, 0, 0)),
                pl.BlockSpec((KH * KW, Cout, Cin), lambda g: (0, 0, 0)),
                pl.BlockSpec((Cout, 1), lambda g: (0, 0)),
            ],
            out_specs=pl.BlockSpec((nb, Cout, Lp), lambda g: (g, 0, 0)),
            scratch_shapes=[pltpu.VMEM((nb, Cin, FLATp), jnp.float32)],
        ),
        compiler_params=pltpu.CompilerParams(
            dimension_semantics=("parallel",),
            vmem_limit_bytes=vmem_limit),
    )(x_flat, w3d, b2d)

    # Free-ish slice + reshape dropping the batch pad, lane pad and the Wp-Wo
    # garbage columns.  (At scale, let the consumer accept the padded layout
    # instead of paying this extra HBM pass.)
    out = out_flat[:N, :, :L].reshape(N, Cout, Ho, Wp)[:, :, :, :Wo]
    return out


# ---------------------------------------------------------------------------
# Parameter init matching the PyTorch module (xavier_uniform weight, zero bias)
# ---------------------------------------------------------------------------
def xavier_uniform_conv(key, shape):
    out_ch, in_ch, kh, kw = shape
    fan_in = in_ch * kh * kw
    fan_out = out_ch * kh * kw
    bound = float(np.sqrt(6.0 / (fan_in + fan_out)))
    return jax.random.uniform(key, shape, jnp.float32, -bound, bound)


def init_meta_conv2d_params(key, in_channels, out_channels, kernel_size,
                            use_bias=True):
    params = {"weight": xavier_uniform_conv(
        key, (out_channels, in_channels, kernel_size, kernel_size))}
    if use_bias:
        params["bias"] = jnp.zeros((out_channels,), jnp.float32)
    return params


# ---------------------------------------------------------------------------
# Pure-JAX reference (lax.conv) for correctness checking
# ---------------------------------------------------------------------------
def conv2d_reference(x, weight, bias, stride=1, padding=0, dilation=1,
                     groups=1):
    dn = jax.lax.conv_dimension_numbers(x.shape, weight.shape,
                                        ("NCHW", "OIHW", "NCHW"))
    y = jax.lax.conv_general_dilated(
        x, weight, (stride, stride),
        ((padding, padding), (padding, padding)),
        rhs_dilation=(dilation, dilation),
        dimension_numbers=dn, feature_group_count=groups)
    if bias is not None:
        y = y + bias[None, :, None, None]
    return y


if __name__ == "__main__":
    key = jax.random.PRNGKey(0)
    k_x, k_w, k_b, k_w2, k_x3 = jax.random.split(key, 5)

    # Config 1: MetaConv2dLayer(4, 8, kernel_size=3, stride=1, padding=1, bias)
    N, Cin, H, W = 2, 4, 16, 16
    Cout, K, P = 8, 3, 1
    x = jax.random.normal(k_x, (N, Cin, H, W), jnp.float32)
    weight = xavier_uniform_conv(k_w, (Cout, Cin, K, K))
    # Nonzero bias (MetaConv2dLayer's forward accepts externally supplied params).
    bias = 0.1 * jax.random.normal(k_b, (Cout,), jnp.float32)

    out = meta_conv2d(x, weight, bias, padding=P)
    out = jax.block_until_ready(out)
    ref = conv2d_reference(x, weight, bias, padding=P)
    np.testing.assert_allclose(np.asarray(out), np.asarray(ref),
                               rtol=1e-4, atol=1e-4)

    # Config 2: MetaConv2dLayer(4, 8, kernel_size=1, padding=0) with zero bias
    # (exercises the no-padding / single-tap path).
    params = init_meta_conv2d_params(k_w2, Cin, Cout, 1, use_bias=True)
    out2 = meta_conv2d(x, params["weight"], params["bias"], padding=0)
    out2 = jax.block_until_ready(out2)
    ref2 = conv2d_reference(x, params["weight"], params["bias"], padding=0)
    np.testing.assert_allclose(np.asarray(out2), np.asarray(ref2),
                               rtol=1e-4, atol=1e-4)

    # Config 3: larger / ragged batch (N=5 -> NB=3, grid=2 with one padded
    # image) exercising the multi-image-per-step path on the 3x3 conv.
    N3 = 5
    x3 = jax.random.normal(k_x3, (N3, Cin, H, W), jnp.float32)
    out3 = meta_conv2d(x3, weight, bias, padding=P)
    out3 = jax.block_until_ready(out3)
    ref3 = conv2d_reference(x3, weight, bias, padding=P)
    np.testing.assert_allclose(np.asarray(out3), np.asarray(ref3),
                               rtol=1e-4, atol=1e-4)

    print("KERNEL_OK")
</pallas_src>

<mosaic_0001>
module attributes {stable_mosaic.version = 11 : i64} {
  func.func @_conv2d_taps_kernel(%arg0: i32, %arg1: memref<1x4x256xf32, #tpu.memory_space<vmem>>, %arg2: memref<9x8x4xf32, #tpu.memory_space<vmem>>, %arg3: memref<8x1xf32, #tpu.memory_space<vmem>>, %arg4: memref<1x8x384xf32, #tpu.memory_space<vmem>>, %arg5: memref<1x4x422xf32, #tpu.memory_space<vmem>>) attributes {dimension_semantics = [#tpu.dimension_semantics<parallel>], iteration_bounds = array<i64: 2>, scalar_prefetch = 0 : i64, scratch_operands = 1 : i64, tpu.core_type = #tpu.core_type<tc>, window_params = [{transform_indices = @transform_0, window_bounds = array<i64: 1, 4, 256>}, {pipeline_mode = #tpu.pipeline_mode<synchronous>, transform_indices = @transform_1, window_bounds = array<i64: 9, 8, 4>}, {pipeline_mode = #tpu.pipeline_mode<synchronous>, transform_indices = @transform_2, window_bounds = array<i64: 8, 1>}, {transform_indices = @transform_3, window_bounds = array<i64: 1, 8, 384>}]} {
    %cst = arith.constant 0.000000e+00 : f32
    %0 = vector.broadcast %cst : f32 to vector<1x4x422xf32>
    %c0 = arith.constant 0 : index
    %c0_0 = arith.constant 0 : index
    %c0_1 = arith.constant 0 : index
    %1 = vector.load %arg5[%c0, %c0_0, %c0_1] : memref<1x4x422xf32, #tpu.memory_space<vmem>>, vector<1x4x422xf32>
    tpu.vector_store %arg5[%c0, %c0_0, %c0_1], %0 {strides = array<i32>} : memref<1x4x422xf32, #tpu.memory_space<vmem>>, vector<1x4x422xf32>,
    %c0_2 = arith.constant 0 : index
    %c0_3 = arith.constant 0 : index
    %c0_4 = arith.constant 0 : index
    %2 = vector.load %arg1[%c0_2, %c0_3, %c0_4] : memref<1x4x256xf32, #tpu.memory_space<vmem>>, vector<1x4x16xf32>
    %3 = vector.shape_cast %2 : vector<1x4x16xf32> to vector<4x16xf32>
    %c0_5 = arith.constant 0 : index
    %c0_6 = arith.constant 0 : index
    %c19 = arith.constant 19 : index
    %4 = vector.load %arg5[%c0_5, %c0_6, %c19] : memref<1x4x422xf32, #tpu.memory_space<vmem>>, vector<1x4x16xf32>
    %5 = vector.shape_cast %4 : vector<1x4x16xf32> to vector<4x16xf32>
    %6 = vector.shape_cast %3 : vector<4x16xf32> to vector<1x4x16xf32>
    tpu.vector_store %arg5[%c0_5, %c0_6, %c19], %6 {strides = array<i32>} : memref<1x4x422xf32, #tpu.memory_space<vmem>>, vector<1x4x16xf32>,
    %c0_7 = arith.constant 0 : index
    %c0_8 = arith.constant 0 : index
    %c16 = arith.constant 16 : index
    %7 = vector.load %arg1[%c0_7, %c0_8, %c16] : memref<1x4x256xf32, #tpu.memory_space<vmem>>, vector<1x4x16xf32>
    %8 = vector.shape_cast %7 : vector<1x4x16xf32> to vector<4x16xf32>
    %c0_9 = arith.constant 0 : index
    %c0_10 = arith.constant 0 : index
    %c37 = arith.constant 37 : index
    %9 = vector.load %arg5[%c0_9, %c0_10, %c37] : memref<1x4x422xf32, #tpu.memory_space<vmem>>, vector<1x4x16xf32>
    %10 = vector.shape_cast %9 : vector<1x4x16xf32> to vector<4x16xf32>
    %11 = vector.shape_cast %8 : vector<4x16xf32> to vector<1x4x16xf32>
    tpu.vector_store %arg5[%c0_9, %c0_10, %c37], %11 {strides = array<i32>} : memref<1x4x422xf32, #tpu.memory_space<vmem>>, vector<1x4x16xf32>,
    %c0_11 = arith.constant 0 : index
    %c0_12 = arith.constant 0 : index
    %c32 = arith.constant 32 : index
    %12 = vector.load %arg1[%c0_11, %c0_12, %c32] : memref<1x4x256xf32, #tpu.memory_space<vmem>>, vector<1x4x16xf32>
    %13 = vector.shape_cast %12 : vector<1x4x16xf32> to vector<4x16xf32>
    %c0_13 = arith.constant 0 : index
    %c0_14 = arith.constant 0 : index
    %c55 = arith.constant 55 : index
    %14 = vector.load %arg5[%c0_13, %c0_14, %c55] : memref<1x4x422xf32, #tpu.memory_space<vmem>>, vector<1x4x16xf32>
    %15 = vector.shape_cast %14 : vector<1x4x16xf32> to vector<4x16xf32>
    %16 = vector.shape_cast %13 : vector<4x16xf32> to vector<1x4x16xf32>
    tpu.vector_store %arg5[%c0_13, %c0_14, %c55], %16 {strides = array<i32>} : memref<1x4x422xf32, #tpu.memory_space<vmem>>, vector<1x4x16xf32>,
    %c0_15 = arith.constant 0 : index
    %c0_16 = arith.constant 0 : index
    %c48 = arith.constant 48 : index
    %17 = vector.load %arg1[%c0_15, %c0_16, %c48] : memref<1x4x256xf32, #tpu.memory_space<vmem>>, vector<1x4x16xf32>
    %18 = vector.shape_cast %17 : vector<1x4x16xf32> to vector<4x16xf32>
    %c0_17 = arith.constant 0 : index
    %c0_18 = arith.constant 0 : index
    %c73 = arith.constant 73 : index
    %19 = vector.load %arg5[%c0_17, %c0_18, %c73] : memref<1x4x422xf32, #tpu.memory_space<vmem>>, vector<1x4x16xf32>
    %20 = vector.shape_cast %19 : vector<1x4x16xf32> to vector<4x16xf32>
    %21 = vector.shape_cast %18 : vector<4x16xf32> to vector<1x4x16xf32>
    tpu.vector_store %arg5[%c0_17, %c0_18, %c73], %21 {strides = array<i32>} : memref<1x4x422xf32, #tpu.memory_space<vmem>>, vector<1x4x16xf32>,
    %c0_19 = arith.constant 0 : index
    %c0_20 = arith.constant 0 : index
    %c64 = arith.constant 64 : index
    %22 = vector.load %arg1[%c0_19, %c0_20, %c64] : memref<1x4x256xf32, #tpu.memory_space<vmem>>, vector<1x4x16xf32>
    %23 = vector.shape_cast %22 : vector<1x4x16xf32> to vector<4x16xf32>
    %c0_21 = arith.constant 0 : index
    %c0_22 = arith.constant 0 : index
    %c91 = arith.constant 91 : index
    %24 = vector.load %arg5[%c0_21, %c0_22, %c91] : memref<1x4x422xf32, #tpu.memory_space<vmem>>, vector<1x4x16xf32>
    %25 = vector.shape_cast %24 : vector<1x4x16xf32> to vector<4x16xf32>
    %26 = vector.shape_cast %23 : vector<4x16xf32> to vector<1x4x16xf32>
    tpu.vector_store %arg5[%c0_21, %c0_22, %c91], %26 {strides = array<i32>} : memref<1x4x422xf32, #tpu.memory_space<vmem>>, vector<1x4x16xf32>,
    %c0_23 = arith.constant 0 : index
    %c0_24 = arith.constant 0 : index
    %c80 = arith.constant 80 : index
    %27 = vector.load %arg1[%c0_23, %c0_24, %c80] : memref<1x4x256xf32, #tpu.memory_space<vmem>>, vector<1x4x16xf32>
    %28 = vector.shape_cast %27 : vector<1x4x16xf32> to vector<4x16xf32>
    %c0_25 = arith.constant 0 : index
    %c0_26 = arith.constant 0 : index
    %c109 = arith.constant 109 : index
    %29 = vector.load %arg5[%c0_25, %c0_26, %c109] : memref<1x4x422xf32, #tpu.memory_space<vmem>>, vector<1x4x16xf32>
    %30 = vector.shape_cast %29 : vector<1x4x16xf32> to vector<4x16xf32>
    %31 = vector.shape_cast %28 : vector<4x16xf32> to vector<1x4x16xf32>
    tpu.vector_store %arg5[%c0_25, %c0_26, %c109], %31 {strides = array<i32>} : memref<1x4x422xf32, #tpu.memory_space<vmem>>, vector<1x4x16xf32>,
    %c0_27 = arith.constant 0 : index
    %c0_28 = arith.constant 0 : index
    %c96 = arith.constant 96 : index
    %32 = vector.load %arg1[%c0_27, %c0_28, %c96] : memref<1x4x256xf32, #tpu.memory_space<vmem>>, vector<1x4x16xf32>
    %33 = vector.shape_cast %32 : vector<1x4x16xf32> to vector<4x16xf32>
    %c0_29 = arith.constant 0 : index
    %c0_30 = arith.constant 0 : index
    %c127 = arith.constant 127 : index
    %34 = vector.load %arg5[%c0_29, %c0_30, %c127] : memref<1x4x422xf32, #tpu.memory_space<vmem>>, vector<1x4x16xf32>
    %35 = vector.shape_cast %34 : vector<1x4x16xf32> to vector<4x16xf32>
    %36 = vector.shape_cast %33 : vector<4x16xf32> to vector<1x4x16xf32>
    tpu.vector_store %arg5[%c0_29, %c0_30, %c127], %36 {strides = array<i32>} : memref<1x4x422xf32, #tpu.memory_space<vmem>>, vector<1x4x16xf32>,
    %c0_31 = arith.constant 0 : index
    %c0_32 = arith.constant 0 : index
    %c112 = arith.constant 112 : index
    %37 = vector.load %arg1[%c0_31, %c0_32, %c112] : memref<1x4x256xf32, #tpu.memory_space<vmem>>, vector<1x4x16xf32>
    %38 = vector.shape_cast %37 : vector<1x4x16xf32> to vector<4x16xf32>
    %c0_33 = arith.constant 0 : index
    %c0_34 = arith.constant 0 : index
    %c145 = arith.constant 145 : index
    %39 = vector.load %arg5[%c0_33, %c0_34, %c145] : memref<1x4x422xf32, #tpu.memory_space<vmem>>, vector<1x4x16xf32>
    %40 = vector.shape_cast %39 : vector<1x4x16xf32> to vector<4x16xf32>
    %41 = vector.shape_cast %38 : vector<4x16xf32> to vector<1x4x16xf32>
    tpu.vector_store %arg5[%c0_33, %c0_34, %c145], %41 {strides = array<i32>} : memref<1x4x422xf32, #tpu.memory_space<vmem>>, vector<1x4x16xf32>,
    %c0_35 = arith.constant 0 : index
    %c0_36 = arith.constant 0 : index
    %c128 = arith.constant 128 : index
    %42 = vector.load %arg1[%c0_35, %c0_36, %c128] : memref<1x4x256xf32, #tpu.memory_space<vmem>>, vector<1x4x16xf32>
    %43 = vector.shape_cast %42 : vector<1x4x16xf32> to vector<4x16xf32>
    %c0_37 = arith.constant 0 : index
    %c0_38 = arith.constant 0 : index
    %c163 = arith.constant 163 : index
    %44 = vector.load %arg5[%c0_37, %c0_38, %c163] : memref<1x4x422xf32, #tpu.memory_space<vmem>>, vector<1x4x16xf32>
    %45 = vector.shape_cast %44 : vector<1x4x16xf32> to vector<4x16xf32>
    %46 = vector.shape_cast %43 : vector<4x16xf32> to vector<1x4x16xf32>
    tpu.vector_store %arg5[%c0_37, %c0_38, %c163], %46 {strides = array<i32>} : memref<1x4x422xf32, #tpu.memory_space<vmem>>, vector<1x4x16xf32>,
    %c0_39 = arith.constant 0 : index
    %c0_40 = arith.constant 0 : index
    %c144 = arith.constant 144 : index
    %47 = vector.load %arg1[%c0_39, %c0_40, %c144] : memref<1x4x256xf32, #tpu.memory_space<vmem>>, vector<1x4x16xf32>
    %48 = vector.shape_cast %47 : vector<1x4x16xf32> to vector<4x16xf32>
    %c0_41 = arith.constant 0 : index
    %c0_42 = arith.constant 0 : index
    %c181 = arith.constant 181 : index
    %49 = vector.load %arg5[%c0_41, %c0_42, %c181] : memref<1x4x422xf32, #tpu.memory_space<vmem>>, vector<1x4x16xf32>
    %50 = vector.shape_cast %49 : vector<1x4x16xf32> to vector<4x16xf32>
    %51 = vector.shape_cast %48 : vector<4x16xf32> to vector<1x4x16xf32>
    tpu.vector_store %arg5[%c0_41, %c0_42, %c181], %51 {strides = array<i32>} : memref<1x4x422xf32, #tpu.memory_space<vmem>>, vector<1x4x16xf32>,
    %c0_43 = arith.constant 0 : index
    %c0_44 = arith.constant 0 : index
    %c160 = arith.constant 160 : index
    %52 = vector.load %arg1[%c0_43, %c0_44, %c160] : memref<1x4x256xf32, #tpu.memory_space<vmem>>, vector<1x4x16xf32>
    %53 = vector.shape_cast %52 : vector<1x4x16xf32> to vector<4x16xf32>
    %c0_45 = arith.constant 0 : index
    %c0_46 = arith.constant 0 : index
    %c199 = arith.constant 199 : index
    %54 = vector.load %arg5[%c0_45, %c0_46, %c199] : memref<1x4x422xf32, #tpu.memory_space<vmem>>, vector<1x4x16xf32>
    %55 = vector.shape_cast %54 : vector<1x4x16xf32> to vector<4x16xf32>
    %56 = vector.shape_cast %53 : vector<4x16xf32> to vector<1x4x16xf32>
    tpu.vector_store %arg5[%c0_45, %c0_46, %c199], %56 {strides = array<i32>} : memref<1x4x422xf32, #tpu.memory_space<vmem>>, vector<1x4x16xf32>,
    %c0_47 = arith.constant 0 : index
    %c0_48 = arith.constant 0 : index
    %c176 = arith.constant 176 : index
    %57 = vector.load %arg1[%c0_47, %c0_48, %c176] : memref<1x4x256xf32, #tpu.memory_space<vmem>>, vector<1x4x16xf32>
    %58 = vector.shape_cast %57 : vector<1x4x16xf32> to vector<4x16xf32>
    %c0_49 = arith.constant 0 : index
    %c0_50 = arith.constant 0 : index
    %c217 = arith.constant 217 : index
    %59 = vector.load %arg5[%c0_49, %c0_50, %c217] : memref<1x4x422xf32, #tpu.memory_space<vmem>>, vector<1x4x16xf32>
    %60 = vector.shape_cast %59 : vector<1x4x16xf32> to vector<4x16xf32>
    %61 = vector.shape_cast %58 : vector<4x16xf32> to vector<1x4x16xf32>
    tpu.vector_store %arg5[%c0_49, %c0_50, %c217], %61 {strides = array<i32>} : memref<1x4x422xf32, #tpu.memory_space<vmem>>, vector<1x4x16xf32>,
    %c0_51 = arith.constant 0 : index
    %c0_52 = arith.constant 0 : index
    %c192 = arith.constant 192 : index
    %62 = vector.load %arg1[%c0_51, %c0_52, %c192] : memref<1x4x256xf32, #tpu.memory_space<vmem>>, vector<1x4x16xf32>
    %63 = vector.shape_cast %62 : vector<1x4x16xf32> to vector<4x16xf32>
    %c0_53 = arith.constant 0 : index
    %c0_54 = arith.constant 0 : index
    %c235 = arith.constant 235 : index
    %64 = vector.load %arg5[%c0_53, %c0_54, %c235] : memref<1x4x422xf32, #tpu.memory_space<vmem>>, vector<1x4x16xf32>
    %65 = vector.shape_cast %64 : vector<1x4x16xf32> to vector<4x16xf32>
    %66 = vector.shape_cast %63 : vector<4x16xf32> to vector<1x4x16xf32>
    tpu.vector_store %arg5[%c0_53, %c0_54, %c235], %66 {strides = array<i32>} : memref<1x4x422xf32, #tpu.memory_space<vmem>>, vector<1x4x16xf32>,
    %c0_55 = arith.constant 0 : index
    %c0_56 = arith.constant 0 : index
    %c208 = arith.constant 208 : index
    %67 = vector.load %arg1[%c0_55, %c0_56, %c208] : memref<1x4x256xf32, #tpu.memory_space<vmem>>, vector<1x4x16xf32>
    %68 = vector.shape_cast %67 : vector<1x4x16xf32> to vector<4x16xf32>
    %c0_57 = arith.constant 0 : index
    %c0_58 = arith.constant 0 : index
    %c253 = arith.constant 253 : index
    %69 = vector.load %arg5[%c0_57, %c0_58, %c253] : memref<1x4x422xf32, #tpu.memory_space<vmem>>, vector<1x4x16xf32>
    %70 = vector.shape_cast %69 : vector<1x4x16xf32> to vector<4x16xf32>
    %71 = vector.shape_cast %68 : vector<4x16xf32> to vector<1x4x16xf32>
    tpu.vector_store %arg5[%c0_57, %c0_58, %c253], %71 {strides = array<i32>} : memref<1x4x422xf32, #tpu.memory_space<vmem>>, vector<1x4x16xf32>,
    %c0_59 = arith.constant 0 : index
    %c0_60 = arith.constant 0 : index
    %c224 = arith.constant 224 : index
    %72 = vector.load %arg1[%c0_59, %c0_60, %c224] : memref<1x4x256xf32, #tpu.memory_space<vmem>>, vector<1x4x16xf32>
    %73 = vector.shape_cast %72 : vector<1x4x16xf32> to vector<4x16xf32>
    %c0_61 = arith.constant 0 : index
    %c0_62 = arith.constant 0 : index
    %c271 = arith.constant 271 : index
    %74 = vector.load %arg5[%c0_61, %c0_62, %c271] : memref<1x4x422xf32, #tpu.memory_space<vmem>>, vector<1x4x16xf32>
    %75 = vector.shape_cast %74 : vector<1x4x16xf32> to vector<4x16xf32>
    %76 = vector.shape_cast %73 : vector<4x16xf32> to vector<1x4x16xf32>
    tpu.vector_store %arg5[%c0_61, %c0_62, %c271], %76 {strides = array<i32>} : memref<1x4x422xf32, #tpu.memory_space<vmem>>, vector<1x4x16xf32>,
    %c0_63 = arith.constant 0 : index
    %c0_64 = arith.constant 0 : index
    %c240 = arith.constant 240 : index
    %77 = vector.load %arg1[%c0_63, %c0_64, %c240] : memref<1x4x256xf32, #tpu.memory_space<vmem>>, vector<1x4x16xf32>
    %78 = vector.shape_cast %77 : vector<1x4x16xf32> to vector<4x16xf32>
    %c0_65 = arith.constant 0 : index
    %c0_66 = arith.constant 0 : index
    %c289 = arith.constant 289 : index
    %79 = vector.load %arg5[%c0_65, %c0_66, %c289] : memref<1x4x422xf32, #tpu.memory_space<vmem>>, vector<1x4x16xf32>
    %80 = vector.shape_cast %79 : vector<1x4x16xf32> to vector<4x16xf32>
    %81 = vector.shape_cast %78 : vector<4x16xf32> to vector<1x4x16xf32>
    tpu.vector_store %arg5[%c0_65, %c0_66, %c289], %81 {strides = array<i32>} : memref<1x4x422xf32, #tpu.memory_space<vmem>>, vector<1x4x16xf32>,
    %c0_67 = arith.constant 0 : index
    %c0_68 = arith.constant 0 : index
    %82 = vector.load %arg3[%c0_67, %c0_68] : memref<8x1xf32, #tpu.memory_space<vmem>>, vector<8x1xf32>
    %c0_69 = arith.constant 0 : index
    %c0_70 = arith.constant 0 : index
    %c0_71 = arith.constant 0 : index
    %83 = vector.load %arg2[%c0_69, %c0_70, %c0_71] : memref<9x8x4xf32, #tpu.memory_space<vmem>>, vector<1x8x4xf32>
    %84 = vector.shape_cast %83 : vector<1x8x4xf32> to vector<8x4xf32>
    %c0_72 = arith.constant 0 : index
    %c0_73 = arith.constant 0 : index
    %c0_74 = arith.constant 0 : index
    %85 = vector.load %arg5[%c0_72, %c0_73, %c0_74] : memref<1x4x422xf32, #tpu.memory_space<vmem>>, vector<1x4x384xf32>
    %86 = vector.shape_cast %85 : vector<1x4x384xf32> to vector<4x384xf32>
    %cst_75 = arith.constant dense<0.000000e+00> : vector<8x384xf32>
    %87 = tpu.matmul %84, %86, %cst_75 {dimension_numbers = #tpu.dot_dimension_numbers<[1], [0], [0], [1], [0, 0, 1, 1], [], []>} : vector<8x4xf32>, vector<4x384xf32>, vector<8x384xf32> -> vector<8x384xf32>
    %c1 = arith.constant 1 : index
    %c0_76 = arith.constant 0 : index
    %c0_77 = arith.constant 0 : index
    %88 = vector.load %arg2[%c1, %c0_76, %c0_77] : memref<9x8x4xf32, #tpu.memory_space<vmem>>, vector<1x8x4xf32>
    %89 = vector.shape_cast %88 : vector<1x8x4xf32> to vector<8x4xf32>
    %c0_78 = arith.constant 0 : index
    %c0_79 = arith.constant 0 : index
    %c1_80 = arith.constant 1 : index
    %90 = vector.load %arg5[%c0_78, %c0_79, %c1_80] : memref<1x4x422xf32, #tpu.memory_space<vmem>>, vector<1x4x384xf32>
    %91 = vector.shape_cast %90 : vector<1x4x384xf32> to vector<4x384xf32>
    %cst_81 = arith.constant dense<0.000000e+00> : vector<8x384xf32>
    %92 = tpu.matmul %89, %91, %cst_81 {dimension_numbers = #tpu.dot_dimension_numbers<[1], [0], [0], [1], [0, 0, 1, 1], [], []>} : vector<8x4xf32>, vector<4x384xf32>, vector<8x384xf32> -> vector<8x384xf32>
    %93 = arith.addf %87, %92 : vector<8x384xf32>
    %c2 = arith.constant 2 : index
    %c0_82 = arith.constant 0 : index
    %c0_83 = arith.constant 0 : index
    %94 = vector.load %arg2[%c2, %c0_82, %c0_83] : memref<9x8x4xf32, #tpu.memory_space<vmem>>, vector<1x8x4xf32>
    %95 = vector.shape_cast %94 : vector<1x8x4xf32> to vector<8x4xf32>
    %c0_84 = arith.constant 0 : index
    %c0_85 = arith.constant 0 : index
    %c2_86 = arith.constant 2 : index
    %96 = vector.load %arg5[%c0_84, %c0_85, %c2_86] : memref<1x4x422xf32, #tpu.memory_space<vmem>>, vector<1x4x384xf32>
    %97 = vector.shape_cast %96 : vector<1x4x384xf32> to vector<4x384xf32>
    %cst_87 = arith.constant dense<0.000000e+00> : vector<8x384xf32>
    %98 = tpu.matmul %95, %97, %cst_87 {dimension_numbers = #tpu.dot_dimension_numbers<[1], [0], [0], [1], [0, 0, 1, 1], [], []>} : vector<8x4xf32>, vector<4x384xf32>, vector<8x384xf32> -> vector<8x384xf32>
    %99 = arith.addf %93, %98 : vector<8x384xf32>
    %c3 = arith.constant 3 : index
    %c0_88 = arith.constant 0 : index
    %c0_89 = arith.constant 0 : index
    %100 = vector.load %arg2[%c3, %c0_88, %c0_89] : memref<9x8x4xf32, #tpu.memory_space<vmem>>, vector<1x8x4xf32>
    %101 = vector.shape_cast %100 : vector<1x8x4xf32> to vector<8x4xf32>
    %c0_90 = arith.constant 0 : index
    %c0_91 = arith.constant 0 : index
    %c18 = arith.constant 18 : index
    %102 = vector.load %arg5[%c0_90, %c0_91, %c18] : memref<1x4x422xf32, #tpu.memory_space<vmem>>, vector<1x4x384xf32>
    %103 = vector.shape_cast %102 : vector<1x4x384xf32> to vector<4x384xf32>
    %cst_92 = arith.constant dense<0.000000e+00> : vector<8x384xf32>
    %104 = tpu.matmul %101, %103, %cst_92 {dimension_numbers = #tpu.dot_dimension_numbers<[1], [0], [0], [1], [0, 0, 1, 1], [], []>} : vector<8x4xf32>, vector<4x384xf32>, vector<8x384xf32> -> vector<8x384xf32>
    %105 = arith.addf %99, %104 : vector<8x384xf32>
    %c4 = arith.constant 4 : index
    %c0_93 = arith.constant 0 : index
    %c0_94 = arith.constant 0 : index
    %106 = vector.load %arg2[%c4, %c0_93, %c0_94] : memref<9x8x4xf32, #tpu.memory_space<vmem>>, vector<1x8x4xf32>
    %107 = vector.shape_cast %106 : vector<1x8x4xf32> to vector<8x4xf32>
    %c0_95 = arith.constant 0 : index
    %c0_96 = arith.constant 0 : index
    %c19_97 = arith.constant 19 : index
    %108 = vector.load %arg5[%c0_95, %c0_96, %c19_97] : memref<1x4x422xf32, #tpu.memory_space<vmem>>, vector<1x4x384xf32>
    %109 = vector.shape_cast %108 : vector<1x4x384xf32> to vector<4x384xf32>
    %cst_98 = arith.constant dense<0.000000e+00> : vector<8x384xf32>
    %110 = tpu.matmul %107, %109, %cst_98 {dimension_numbers = #tpu.dot_dimension_numbers<[1], [0], [0], [1], [0, 0, 1, 1], [], []>} : vector<8x4xf32>, vector<4x384xf32>, vector<8x384xf32> -> vector<8x384xf32>
    %111 = arith.addf %105, %110 : vector<8x384xf32>
    %c5 = arith.constant 5 : index
    %c0_99 = arith.constant 0 : index
    %c0_100 = arith.constant 0 : index
    %112 = vector.load %arg2[%c5, %c0_99, %c0_100] : memref<9x8x4xf32, #tpu.memory_space<vmem>>, vector<1x8x4xf32>
    %113 = vector.shape_cast %112 : vector<1x8x4xf32> to vector<8x4xf32>
    %c0_101 = arith.constant 0 : index
    %c0_102 = arith.constant 0 : index
    %c20 = arith.constant 20 : index
    %114 = vector.load %arg5[%c0_101, %c0_102, %c20] : memref<1x4x422xf32, #tpu.memory_space<vmem>>, vector<1x4x384xf32>
    %115 = vector.shape_cast %114 : vector<1x4x384xf32> to vector<4x384xf32>
    %cst_103 = arith.constant dense<0.000000e+00> : vector<8x384xf32>
    %116 = tpu.matmul %113, %115, %cst_103 {dimension_numbers = #tpu.dot_dimension_numbers<[1], [0], [0], [1], [0, 0, 1, 1], [], []>} : vector<8x4xf32>, vector<4x384xf32>, vector<8x384xf32> -> vector<8x384xf32>
    %117 = arith.addf %111, %116 : vector<8x384xf32>
    %c6 = arith.constant 6 : index
    %c0_104 = arith.constant 0 : index
    %c0_105 = arith.constant 0 : index
    %118 = vector.load %arg2[%c6, %c0_104, %c0_105] : memref<9x8x4xf32, #tpu.memory_space<vmem>>, vector<1x8x4xf32>
    %119 = vector.shape_cast %118 : vector<1x8x4xf32> to vector<8x4xf32>
    %c0_106 = arith.constant 0 : index
    %c0_107 = arith.constant 0 : index
    %c36 = arith.constant 36 : index
    %120 = vector.load %arg5[%c0_106, %c0_107, %c36] : memref<1x4x422xf32, #tpu.memory_space<vmem>>, vector<1x4x384xf32>
    %121 = vector.shape_cast %120 : vector<1x4x384xf32> to vector<4x384xf32>
    %cst_108 = arith.constant dense<0.000000e+00> : vector<8x384xf32>
    %122 = tpu.matmul %119, %121, %cst_108 {dimension_numbers = #tpu.dot_dimension_numbers<[1], [0], [0], [1], [0, 0, 1, 1], [], []>} : vector<8x4xf32>, vector<4x384xf32>, vector<8x384xf32> -> vector<8x384xf32>
    %123 = arith.addf %117, %122 : vector<8x384xf32>
    %c7 = arith.constant 7 : index
    %c0_109 = arith.constant 0 : index
    %c0_110 = arith.constant 0 : index
    %124 = vector.load %arg2[%c7, %c0_109, %c0_110] : memref<9x8x4xf32, #tpu.memory_space<vmem>>, vector<1x8x4xf32>
    %125 = vector.shape_cast %124 : vector<1x8x4xf32> to vector<8x4xf32>
    %c0_111 = arith.constant 0 : index
    %c0_112 = arith.constant 0 : index
    %c37_113 = arith.constant 37 : index
    %126 = vector.load %arg5[%c0_111, %c0_112, %c37_113] : memref<1x4x422xf32, #tpu.memory_space<vmem>>, vector<1x4x384xf32>
    %127 = vector.shape_cast %126 : vector<1x4x384xf32> to vector<4x384xf32>
    %cst_114 = arith.constant dense<0.000000e+00> : vector<8x384xf32>
    %128 = tpu.matmul %125, %127, %cst_114 {dimension_numbers = #tpu.dot_dimension_numbers<[1], [0], [0], [1], [0, 0, 1, 1], [], []>} : vector<8x4xf32>, vector<4x384xf32>, vector<8x384xf32> -> vector<8x384xf32>
    %129 = arith.addf %123, %128 : vector<8x384xf32>
    %c8 = arith.constant 8 : index
    %c0_115 = arith.constant 0 : index
    %c0_116 = arith.constant 0 : index
    %130 = vector.load %arg2[%c8, %c0_115, %c0_116] : memref<9x8x4xf32, #tpu.memory_space<vmem>>, vector<1x8x4xf32>
    %131 = vector.shape_cast %130 : vector<1x8x4xf32> to vector<8x4xf32>
    %c0_117 = arith.constant 0 : index
    %c0_118 = arith.constant 0 : index
    %c38 = arith.constant 38 : index
    %132 = vector.load %arg5[%c0_117, %c0_118, %c38] : memref<1x4x422xf32, #tpu.memory_space<vmem>>, vector<1x4x384xf32>
    %133 = vector.shape_cast %132 : vector<1x4x384xf32> to vector<4x384xf32>
    %cst_119 = arith.constant dense<0.000000e+00> : vector<8x384xf32>
    %134 = tpu.matmul %131, %133, %cst_119 {dimension_numbers = #tpu.dot_dimension_numbers<[1], [0], [0], [1], [0, 0, 1, 1], [], []>} : vector<8x4xf32>, vector<4x384xf32>, vector<8x384xf32> -> vector<8x384xf32>
    %135 = arith.addf %129, %134 : vector<8x384xf32>
    %136 = vector.broadcast %82 : vector<8x1xf32> to vector<8x384xf32>
    %137 = arith.addf %135, %136 : vector<8x384xf32>
    %c0_120 = arith.constant 0 : index
    %c0_121 = arith.constant 0 : index
    %c0_122 = arith.constant 0 : index
    %138 = vector.load %arg4[%c0_120, %c0_121, %c0_122] : memref<1x8x384xf32, #tpu.memory_space<vmem>>, vector<1x8x384xf32>
    %139 = vector.shape_cast %138 : vector<1x8x384xf32> to vector<8x384xf32>
    %140 = vector.shape_cast %137 : vector<8x384xf32> to vector<1x8x384xf32>
    tpu.vector_store %arg4[%c0_120, %c0_121, %c0_122], %140 {strides = array<i32>} : memref<1x8x384xf32, #tpu.memory_space<vmem>>, vector<1x8x384xf32>,
    return
  }
  func.func @transform_0(%arg0: i32) -> (i32, i32, i32) {
    %c0_i32 = arith.constant 0 : i32
    %c0_i32_0 = arith.constant 0 : i32
    %c0_i32_1 = arith.constant 0 : i32
    return %arg0, %c0_i32, %c0_i32_0 : i32, i32, i32
  }
  func.func @transform_1(%arg0: i32) -> (i32, i32, i32) {
    %c0_i32 = arith.constant 0 : i32
    %c0_i32_0 = arith.constant 0 : i32
    %c0_i32_1 = arith.constant 0 : i32
    %c0_i32_2 = arith.constant 0 : i32
    return %c0_i32, %c0_i32_0, %c0_i32_1 : i32, i32, i32
  }
  func.func @transform_2(%arg0: i32) -> (i32, i32) {
    %c0_i32 = arith.constant 0 : i32
    %c0_i32_0 = arith.constant 0 : i32
    %c0_i32_1 = arith.constant 0 : i32
    return %c0_i32, %c0_i32_0 : i32, i32
  }
  func.func @transform_3(%arg0: i32) -> (i32, i32, i32) {
    %c0_i32 = arith.constant 0 : i32
    %c0_i32_0 = arith.constant 0 : i32
    %c0_i32_1 = arith.constant 0 : i32
    return %arg0, %c0_i32, %c0_i32_0 : i32, i32, i32
  }
}

</mosaic_0001>

<bundles_post_ra>
// kernel: meta_conv2d.1
= control target key start
LH: loop header
LB: loop body
LE: loop exit
PB: predicated region body
PF: predicated region fallthrough
CT: control target
= control target key end

     0   :  { %s2137_s12 = smov 0   ;;  %s2335_s0 = inlined_call_operand.vmem [shape: f32[2,4,256], index: 0, kind: input, shape index: {}]   ;;  %s2336_s1 = inlined_call_operand.vmem [shape: f32[9,8,4], index: 1, kind: input, shape index: {}]   ;;  %s2337_s2 = inlined_call_operand.vmem [shape: f32[8,1], index: 2, kind: input, shape index: {}]   ;;  %s2338_s3 = inlined_call_operand.vmem [shape: f32[2,8,384], index: 3, kind: output, shape index: {}]  }
   0x1 LB: > { %s1900_s13 = sadd.s32 4294967295, %s2088_s12   ;;  %p1904_p0 = scmp.ge.s32.totalorder %s2088_s12, 1  ;;  %s2088_s12 = sphi %s2137_s12, %s13_s12  }
   0x2   : > { %p137_p1 = scmp.lt.s32.totalorder %s2088_s12, 3 }
   0x4   : > { %p138_p2 = pnand %p1904_p0, %p137_p1 }
   0x5   : > { %p161_p3 = scmp.lt.s32.totalorder (!%p138_p2), %s1900_s13, 1  ;;  %v2090_v0 = vmov (!%p138_p2), 0.0   ;;  %s2091_s18 = smov (!%p138_p2), 23   ;;  %vm172_vm0 = vcmask (!%p138_p2), 1043456   ;;  %vm173_vm1 = vcmask (!%p138_p2), 310276   ;;  %vm181_vm3 = vcmask (!%p138_p2), 281752  }
   0x6   : > { %141 = sbr.rel (%p138_p2) target bundleno = 570 (0x23a), region = 32  ;;  %171 = vst [vmem:[#allocation2] sm:$0xff] (!%p138_p2), %v2090_v0  ;;  %395 = vmatprep.mubr.f32.mxu0 (!%p138_p2), %v2090_v0  ;;  %1982 = vmatprep.subr.mxu1 (!%p138_p2), %v2090_v0  ;;  %s2092_s19 = smov (!%p138_p2), 19   ;;  %vm174_vm2 = vmor (!%p138_p2), %vm173_vm1, %vm172_vm0  ;;  %vm188_vm4 = vcmask (!%p138_p2), 429352   ;;  %vm195_vm5 = vcmask (!%p138_p2), 576952   ;;  %vm202_vm6 = vcmask (!%p138_p2), 724552  }
   0x7   : > { %s2093_s20 = smov (!%p138_p2), 25   ;;  %s2094_s21 = smov (!%p138_p2), 21   ;;  %175 = vst.msk [vmem:[#allocation2 + $0x8] sm:$0xff] (!%p138_p2), %vm174_vm2, %v2090_v0  ;;  %vm209_vm7 = vcmask (!%p138_p2), 872152   ;;  %vm226_vm8 = vcmask (!%p138_p2), 1044472   ;;  %vm227_vm9 = vcmask (!%p138_p2), 121860  }
   0x8   : > { %s2095_s22 = smov (!%p138_p2), 27   ;;  %s2096_s23 = smov (!%p138_p2), 31   ;;  %vm223_vm10 = vcmask (!%p138_p2), 252928   ;;  %vm216_vm11 = vcmask (!%p138_p2), 1019752   ;;  %vm228_vm12 = vmor (!%p138_p2), %vm227_vm9, %vm226_vm8  ;;  %vm235_vm13 = vcmask (!%p138_p2), 265352   ;;  %vm242_vm14 = vcmask (!%p138_p2), 412952  }
   0x9   : > { %s2097_s24 = smov (!%p138_p2), 33   ;;  %s2098_s25 = smov (!%p138_p2), 29   ;;  %vm249_vm15 = vcmask (!%p138_p2), 560552   ;;  %vm256_vm1 = vcmask (!%p138_p2), 708152   ;;  %vm280_vm2 = vcmask (!%p138_p2), 1044456   ;;  %vm289_vm8 = vcmask (!%p138_p2), 248952  }
   0xa   : > { %s2099_s26 = smov (!%p138_p2), 37   ;;  %s2100_s27 = smov (!%p138_p2), 35   ;;  %vm296_vm9 = vcmask (!%p138_p2), 396552   ;;  %v2116_v41 = vmov (!%p138_p2), 0   ;;  %v298_v42 = vld [vmem:[%s2337_s2] sm:$0xff] (!%p138_p2)  ;;  %v1908_v47 = vld [vmem:[%s2336_s1 + $0x8] sm:$0xff] (!%p138_p2) }
   0xb   : > { %s2101_s28 = smov (!%p138_p2), 45   ;;  %s2102_s29 = smov (!%p138_p2), 39   ;;  %2079 = vset.pattern.permute.xlu0 (!%p138_p2), %v2116_v41  ;;  %v299_v53 = vld [vmem:[%s2336_s1] sm:$0xff] (!%p138_p2)  ;;  %v1919_v60 = vld [vmem:[%s2336_s1 + $0x10] sm:$0xff] (!%p138_p2) }
   0xc   : > { %s2103_s30 = smov (!%p138_p2), 41   ;;  %s2104_s4 = smov (!%p138_p2), 43  }
   0xd   : > { %s2340_s13 = smov (!%p161_p3, %s1900_s13), 1  ;;  %s2105_s5 = smov 47  }
   0xe   : > { %s1963_s14 = sshll.u32 %s2340_s13, 3  ;;  %s2106_s6 = smov 49  }
   0xf   : > { %s2154_s17 = scalar_lea.vmem %s2335_s0, %s1963_s14  ;;  %s2107_s7 = smov 127  }
  0x10   : > { %v190_v1 = vld [vmem:[%s2154_s17] sm:$0xf]  ;;  %v244_v9 = vld [vmem:[%s2154_s17 + $0x4] sm:$0xf]  ;;  %s2108_s8 = smov 126   ;;  %s2109_s9 = smov 110  }
  0x11   : > { %v176_v2 = vld [vmem:[%s2154_s17] sm:$0xf]  ;;  %192 = vrot.lane.b32.xlu1 %v190_v1, %s2091_s18  ;;  %v237_v10 = vld [vmem:[%s2154_s17 + $0x4] sm:$0xf]  ;;  %s2111_s10 = smov 109   ;;  %s2112_s11 = smov 108  }
  0x12   : > { %178 = vrot.lane.b32.xlu0 %v176_v2, %s2092_s19  ;;  %v197_v3 = vld [vmem:[%s2154_s17] sm:$0xf]  ;;  %v272_v11 = vld [vmem:[%s2154_s17 + $0x4] sm:$0xf]  ;;  %s2113_s14 = smov 92   ;;  %s2114_s15 = smov 91  }
  0x13   : > { %v183_v4 = vld [vmem:[%s2154_s17] sm:$0xf]  ;;  %v251_v12 = vld [vmem:[%s2154_s17 + $0x4] sm:$0xf]  ;;  %s2115_s16 = smov 90  }
  0x14   : > { %v204_v5 = vld [vmem:[%s2154_s17] sm:$0xf]  ;;  %v258_v13 = vld [vmem:[%s2154_s17 + $0x4] sm:$0xf] }
  0x15   : > { %199 = vrot.lane.b32.xlu1 %v197_v3, %s2093_s20  ;;  %v218_v6 = vld [vmem:[%s2154_s17] sm:$0xf]  ;;  %v265_v14 = vld [vmem:[%s2154_s17 + $0x4] sm:$0xf] }
  0x16   : > { %185 = vrot.lane.b32.xlu0 %v183_v4, %s2094_s21  ;;  %v230_v7 = vld [vmem:[%s2154_s17] sm:$0xf]  ;;  %v284_v15 = vld [vmem:[%s2154_s17 + $0x4] sm:$0xf] }
  0x17   : > { %v211_v8 = vld [vmem:[%s2154_s17] sm:$0xf]  ;;  %v291_v16 = vld [vmem:[%s2154_s17 + $0x4] sm:$0xf] }
  0x19   : > { %206 = vrot.lane.b32.xlu1 %v204_v5, %s2095_s22 }
  0x1a   : > { %220 = vrot.lane.b32.xlu0 %v218_v6, %s2096_s23  ;;  %v1925_v6 = vld [vmem:[%s2336_s1 + $0x18] sm:$0xff] }
  0x1d   : > { %232 = vrot.lane.b32.xlu1 %v230_v7, %s2097_s24 }
  0x1e   : > { %213 = vrot.lane.b32.xlu0 %v211_v8, %s2098_s25 }
  0x21   : > { %246 = vrot.lane.b32.xlu1 %v244_v9, %s2099_s26 }
  0x22   : > { %239 = vrot.lane.b32.xlu0 %v237_v10, %s2100_s27 }
  0x25   : > { %274 = vrot.lane.b32.xlu1 %v272_v11, %s2101_s28 }
  0x26   : > { %253 = vrot.lane.b32.xlu0 %v251_v12, %s2102_s29 }
  0x29   : > { %267 = vrot.lane.b32.xlu1 %v265_v14, %s2104_s4 }
  0x2a   : > { %260 = vrot.lane.b32.xlu0 %v258_v13, %s2103_s30 }
  0x2d   : > { %293 = vrot.lane.b32.xlu1 %v291_v16, %s2106_s6 }
  0x2e   : > { %286 = vrot.lane.b32.xlu0 %v284_v15, %s2105_s5  ;;  %v1931_v15 = vld [vmem:[%s2336_s1 + $0x20] sm:$0xff] }
  0x83   : > { %v193_v17 = vpop.permute.xlu1 %192 }
  0x84   : > { %v179_v18 = vpop.permute.xlu0 %178 }
  0x85   : > { %182 = vst.msk [vmem:[#allocation2] sm:$0xf] %vm181_vm3, %v179_v18  ;;  %vm281_vm3 = vcmask 105476  }
  0x87   : > { %v200_v19 = vpop.permute.xlu1 %199 }
  0x88   : > { %v186_v20 = vpop.permute.xlu0 %185 }
  0x89   : > { %189 = vst.msk [vmem:[#allocation2] sm:$0xf] %vm188_vm4, %v186_v20  ;;  %vm263_vm4 = vcmask 855752  }
  0x8a   : > { %196 = vst.msk [vmem:[#allocation2] sm:$0xf] %vm195_vm5, %v193_v17  ;;  %vm277_vm5 = vcmask 367616  }
  0x8b   : > { %203 = vst.msk [vmem:[#allocation2] sm:$0xf] %vm202_vm6, %v200_v19  ;;  %v207_v21 = vpop.permute.xlu1 %206  ;;  %vm270_vm6 = vcmask 1003352  }
  0x8c   : > { %v221_v22 = vpop.permute.xlu0 %220  ;;  %210 = vst.msk [vmem:[#allocation2] sm:$0xf] %vm209_vm7, %v207_v21  ;;  %vm282_vm7 = vmor %vm281_vm3, %vm280_vm2  ;;  %vm1331_vm2 = vcmask 752640   ;;  %vm1504_vm3 = vcmask 744448  }
  0x8d   : > { %v222_v23 = vrot.slane %v221_v22, 4 }
  0x8f   : > { %v233_v24 = vpop.permute.xlu1 %232  ;;  %v224_v26 = vsel %vm223_vm10, %v222_v23, %v221_v22  ;;  %vm2110_vm10 = vmmov 0   ;;  %v1937_v23 = vld [vmem:[%s2336_s1 + $0x28] sm:$0xff] }
  0x90   : > { %v214_v25 = vpop.permute.xlu0 %213  ;;  %1984 = vmatprep.mubr.msk.f32.mxu1 %vm2110_vm10, %v2090_v0 }
  0x91   : > { %217 = vst.msk [vmem:[#allocation2] sm:$0xf] %vm216_vm11, %v214_v25  ;;  %vm317_vm11 = vcmask 1039360  }
  0x92   : > { %229 = vst.msk [vmem:[#allocation2] sm:$0xff] %vm228_vm12, %v224_v26  ;;  %vm321_vm12 = vcmask 31744  }
  0x93   : > { %236 = vst.msk [vmem:[#allocation2 + $0x4] sm:$0xf] %vm235_vm13, %v233_v24  ;;  %v247_v27 = vpop.permute.xlu1 %246  ;;  %vm639_vm13 = vcmask 1031168  }
  0x94   : > { %v240_v28 = vpop.permute.xlu0 %239 }
  0x95   : > { %243 = vst.msk [vmem:[#allocation2 + $0x4] sm:$0xf] %vm242_vm14, %v240_v28  ;;  %vm812_vm14 = vcmask 900096  }
  0x96   : > { %250 = vst.msk [vmem:[#allocation2 + $0x4] sm:$0xf] %vm249_vm15, %v247_v27  ;;  %vm985_vm15 = vcmask 891904  }
  0x97   : > { %v275_v29 = vpop.permute.xlu1 %274 }
  0x98   : > { %v254_v30 = vpop.permute.xlu0 %253  ;;  %v276_v31 = vrot.slane %v275_v29, 4 }
  0x99   : > { %257 = vst.msk [vmem:[#allocation2 + $0x4] sm:$0xf] %vm256_vm1, %v254_v30  ;;  %vm1158_vm1 = vcmask 883712  }
  0x9a   : > { %v278_v34 = vsel %vm277_vm5, %v276_v31, %v275_v29 }
  0x9b   : > { %v268_v33 = vpop.permute.xlu1 %267 }
  0x9c   : > { %v261_v32 = vpop.permute.xlu0 %260 }
  0x9d   : > { %264 = vst.msk [vmem:[#allocation2 + $0x4] sm:$0xf] %vm263_vm4, %v261_v32  ;;  %vm1677_vm4 = vcmask 736256  }
  0x9e   : > { %271 = vst.msk [vmem:[#allocation2 + $0x4] sm:$0xf] %vm270_vm6, %v268_v33  ;;  %v1943_v33 = vld [vmem:[%s2336_s1 + $0x30] sm:$0xff] }
  0x9f   : > { %283 = vst.msk [vmem:[#allocation2 + $0x4] sm:$0xff] %vm282_vm7, %v278_v34  ;;  %v294_v36 = vpop.permute.xlu1 %293 }
  0xa0   : > { %v287_v35 = vpop.permute.xlu0 %286 }
  0xa1   : > { %290 = vst.msk [vmem:[#allocation2 + $0x8] sm:$0xf] %vm289_vm8, %v287_v35 }
  0xa2   : > { %297 = vst.msk [vmem:[#allocation2 + $0x8] sm:$0xf] %vm296_vm9, %v294_v36 }
  0xa6   : > { %v2174_v37 = vld [vmem:[#allocation2] sm:$0xff] }
  0xa7   : > { %v307_v38 = vcombine.high %v2174_v37, %v2174_v37 }
  0xa9   : > { %311 = vrot.lane.b32.xlu0 %v307_v38, %s2107_s7  ;;  %v304_v39 = vld [vmem:[#allocation2 + $0x8] sm:$0xff] }
  0xaa   : > { %313 = vrot.lane.b32.xlu1 %v304_v39, %s2107_s7  ;;  %v308_v40 = vcombine.high %v304_v39, %v304_v39  ;;  %v301_v5 = vld [vmem:[#allocation2 + $0x8] sm:$0xf] }
  0xad   : > { %309 = vrot.lane.b32.xlu0 %v2174_v37, %s2107_s7 }
  0xae   : > { %631 = vrot.lane.b32.xlu1 %v2174_v37, %s2108_s8 }
  0xb1   : > { %804 = vrot.lane.b32.xlu0 %v2174_v37, %s2109_s9 }
  0xb2   : > { %633 = vrot.lane.b32.xlu1 %v307_v38, %s2108_s8 }
  0xb5   : > { %635 = vrot.lane.b32.xlu0 %v304_v39, %s2108_s8 }
  0xb6   : > { %808 = vrot.lane.b32.xlu1 %v304_v39, %s2109_s9 }
  0xb9   : > { %977 = vrot.lane.b32.xlu0 %v2174_v37, %s2111_s10 }
  0xba   : > { %981 = vrot.lane.b32.xlu1 %v304_v39, %s2111_s10 }
  0xbd   : > { %806 = vrot.lane.b32.xlu0 %v307_v38, %s2109_s9 }
  0xbe   : > { %1154 = vrot.lane.b32.xlu1 %v304_v39, %s2112_s11 }
  0xc1   : > { %1150 = vrot.lane.b32.xlu0 %v2174_v37, %s2112_s11 }
  0xc2   : > { %315 = vrot.lane.b32.xlu1 %v308_v40, %s2107_s7 }
  0xc5   : > { %979 = vrot.lane.b32.xlu0 %v307_v38, %s2111_s10 }
  0xc6   : > { %1325 = vrot.lane.b32.xlu1 %v307_v38, %s2113_s14 }
  0xc9   : > { %1152 = vrot.lane.b32.xlu0 %v307_v38, %s2112_s11 }
  0xca   : > { %637 = vrot.lane.b32.xlu1 %v308_v40, %s2108_s8 }
  0xcd   : > { %1327 = vrot.lane.b32.xlu0 %v304_v39, %s2113_s14 }
  0xce   : > { %810 = vrot.lane.b32.xlu1 %v308_v40, %s2109_s9 }
  0xd1   : > { %1498 = vrot.lane.b32.xlu0 %v307_v38, %s2114_s15 }
  0xd2   : > { %1323 = vrot.lane.b32.xlu1 %v2174_v37, %s2113_s14 }
  0xd5   : > { %983 = vrot.lane.b32.xlu0 %v308_v40, %s2111_s10  ;;  %s2043_s10 = smul.u32 24, %s2340_s13 }
  0xd6   : > { %1500 = vrot.lane.b32.xlu1 %v304_v39, %s2114_s15 }
  0xd9   : > { %1156 = vrot.lane.b32.xlu0 %v308_v40, %s2112_s11 }
  0xda   : > { %1329 = vrot.lane.b32.xlu1 %v308_v40, %s2113_s14 }
  0xdd   : > { %1496 = vrot.lane.b32.xlu0 %v2174_v37, %s2114_s15 }
  0xde   : > { %1502 = vrot.lane.b32.xlu1 %v308_v40, %s2114_s15  ;;  %s170_s15 = scalar_lea.vmem %s2338_s3, %s2043_s10 }
  0xe1   : > { %1671 = vrot.lane.b32.xlu0 %v307_v38, %s2115_s16 }
  0xe2   : > { %1673 = vrot.lane.b32.xlu1 %v304_v39, %s2115_s16 }
  0xe5   : > { %1675 = vrot.lane.b32.xlu0 %v308_v40, %s2115_s16 }
  0xe6   : > { %1669 = vrot.lane.b32.xlu1 %v2174_v37, %s2115_s16 }
  0xe9   : > { %1836 = vperm.xlu0 %2079, %v298_v42   ;;  %v1955_v42 = vld [vmem:[%s2336_s1 + $0x40] sm:$0xff] }
 0x11b   : > { %v312_v43 = vpop.permute.xlu0 %311 }
 0x11c   : > { %v314_v44 = vpop.permute.xlu1 %313 }
 0x11d   : > { %v319_v45 = vsel %vm317_vm11, %v312_v43, %v314_v44 }
 0x11e   : > { %1909 = vmatprep.subr.msk.mxu0 %vm172_vm0, %v319_v45 }
 0x11f   : > { %v310_v46 = vpop.permute.xlu0 %309 }
 0x120   : > { %v632_v48 = vpop.permute.xlu1 %631  ;;  %v318_v49 = vsel %vm317_vm11, %v310_v46, %v312_v43 }
 0x121   : > { %1910 = vmatpush1.msk.msra.mxu0 %vm172_vm0, %v318_v49 }
 0x122   : > { %1911 = vmatmul.mubr.msk.f32.vlgmr.msra.gmra.mrb[0].mxu0 %vm321_vm12, %v1908_v47  ;;  %1914 = vmatprep.subr.msk.mxu0 %vm172_vm0, %v307_v38  ;;  %v1949_v38 = vld [vmem:[%s2336_s1 + $0x38] sm:$0xff] }
 0x123   : > { %1915 = vmatpush1.msk.msra.mxu0 %vm172_vm0, %v2174_v37  ;;  %v805_v50 = vpop.permute.xlu0 %804  ;;  %546 = vmatprep.mubr.f32.mxu0 %v2090_v0 }
 0x124   : > { %v634_v51 = vpop.permute.xlu1 %633 }
 0x125   : > { %v640_v56 = vsel %vm639_vm13, %v632_v48, %v634_v51 }
 0x127   : > { %v636_v52 = vpop.permute.xlu0 %635 }
 0x128   : > { %v641_v54 = vsel %vm639_vm13, %v634_v51, %v636_v52  ;;  %v809_v55 = vpop.permute.xlu1 %808 }
 0x129   : > { %1920 = vmatprep.subr.msk.mxu0 %vm172_vm0, %v641_v54 }
 0x12a   : > { %1916 = vmatmul.mubr.msk.f32.vlgmr.msra.gmra.mrb[0].mxu0 %vm321_vm12, %v299_v53 }
 0x12b   : > { %1921 = vmatpush1.msk.msra.mxu0 %vm172_vm0, %v640_v56  ;;  %v978_v57 = vpop.permute.xlu0 %977  ;;  %716 = vmatprep.mubr.f32.mxu0 %v2090_v0 }
 0x12c   : > { %v2212_v58 = vpop.permute.xlu1 %981 }
 0x12f   : > { %v807_v59 = vpop.permute.xlu0 %806 }
 0x130   : > { %v813_v61 = vsel %vm812_vm14, %v805_v50, %v807_v59  ;;  %v814_v62 = vsel %vm812_vm14, %v807_v59, %v809_v55  ;;  %v2219_v63 = vpop.permute.xlu1 %1154 }
 0x131   : > { %1926 = vmatprep.subr.msk.mxu0 %vm172_vm0, %v814_v62 }
 0x132   : > { %1922 = vmatmul.mubr.msk.f32.vlgmr.msra.gmra.mrb[0].mxu0 %vm321_vm12, %v1919_v60 }
 0x133   : > { %1927 = vmatpush1.msk.msra.mxu0 %vm172_vm0, %v813_v61  ;;  %v1151_v1 = vpop.permute.xlu0 %1150  ;;  %889 = vmatprep.mubr.f32.mxu0 %v2090_v0 }
 0x134   : > { %v316_v2 = vpop.permute.xlu1 %315 }
 0x135   : > { %v320_v3 = vsel %vm317_vm11, %v314_v44, %v316_v2 }
 0x136   : > { %1983 = vmatpush3.msk.msra.mxu1 %vm172_vm0, %v320_v3 }
 0x137   : > { %1987 = vmatprep.subr.mxu1 %v2090_v0  ;;  %v980_v4 = vpop.permute.xlu0 %979  ;;  %1985 = vmatmul.mubr.msk.f32.vlgmr.msra.gmra.mrb[0].mxu1 %vm321_vm12, %v1908_v47 }
 0x138   : > { %v986_v7 = vsel %vm985_vm15, %v978_v57, %v980_v4  ;;  %v987_v8 = vsel %vm985_vm15, %v980_v4, %v2212_v58  ;;  %v1326_v9 = vpop.permute.xlu1 %1325  ;;  %1988 = vmatpush3.msk.msra.mxu1 %vm172_vm0, %v301_v5  ;;  %1989 = vmatprep.mubr.msk.f32.mxu1 %vm2110_vm10, %v2090_v0 }
 0x139   : > { %1932 = vmatprep.subr.msk.mxu0 %vm172_vm0, %v987_v8  ;;  %1992 = vmatprep.subr.mxu1 %v2090_v0 }
 0x13a   : > { %1928 = vmatmul.mubr.msk.f32.vlgmr.msra.gmra.mrb[0].mxu0 %vm321_vm12, %v1925_v6 }
 0x13b   : > { %1933 = vmatpush1.msk.msra.mxu0 %vm172_vm0, %v986_v7  ;;  %v1153_v10 = vpop.permute.xlu0 %1152  ;;  %1990 = vmatmul.mubr.msk.f32.vlgmr.msra.gmra.mrb[2].mxu1 %vm321_vm12, %v299_v53 }
 0x13c   : > { %v1160_v11 = vsel %vm1158_vm1, %v1153_v10, %v2219_v63  ;;  %v638_v12 = vpop.permute.xlu1 %637  ;;  %1994 = vmatprep.mubr.msk.f32.mxu1 %vm2110_vm10, %v2090_v0  ;;  %1062 = vmatprep.mubr.f32.mxu0 %v2090_v0  ;;  %v1159_v18 = vsel %vm1158_vm1, %v1151_v1, %v1153_v10 }
 0x13d   : > { %v642_v13 = vsel %vm639_vm13, %v636_v52, %v638_v12  ;;  %1938 = vmatprep.subr.msk.mxu0 %vm172_vm0, %v1160_v11 }
 0x13e   : > { %1993 = vmatpush3.msk.msra.mxu1 %vm172_vm0, %v642_v13 }
 0x13f   : > { %v1328_v14 = vpop.permute.xlu0 %1327  ;;  %1997 = vmatprep.subr.mxu1 %v2090_v0  ;;  %1995 = vmatmul.mubr.msk.f32.vlgmr.msra.gmra.mrb[4].mxu1 %vm321_vm12, %v1919_v60 }
 0x140   : > { %v811_v16 = vpop.permute.xlu1 %810  ;;  %1999 = vmatprep.mubr.msk.f32.mxu1 %vm2110_vm10, %v2090_v0  ;;  %v1333_v19 = vsel %vm1331_vm2, %v1326_v9, %v1328_v14 }
 0x141   : > { %v815_v17 = vsel %vm812_vm14, %v809_v55, %v811_v16 }
 0x142   : > { %1998 = vmatpush3.msk.msra.mxu1 %vm172_vm0, %v815_v17  ;;  %1934 = vmatmul.mubr.msk.f32.vlgmr.msra.gmra.mrb[0].mxu0 %vm321_vm12, %v1931_v15 }
 0x143   : > { %1939 = vmatpush1.msk.msra.mxu0 %vm172_vm0, %v1159_v18  ;;  %v1499_v20 = vpop.permute.xlu0 %1498  ;;  %2000 = vmatmul.mubr.msk.f32.vlgmr.msra.gmra.mrb[6].mxu1 %vm321_vm12, %v1925_v6 }
 0x144   : > { %1944 = vmatprep.subr.msk.mxu0 %vm172_vm0, %v1333_v19  ;;  %v1324_v21 = vpop.permute.xlu1 %1323  ;;  %2002 = vmatprep.subr.mxu1 %v2090_v0 }
 0x145   : > { %2004 = vmatprep.mubr.msk.f32.mxu1 %vm2110_vm10, %v2090_v0  ;;  %1235 = vmatprep.mubr.f32.mxu0 %v2090_v0  ;;  %v1332_v27 = vsel %vm1331_vm2, %v1324_v21, %v1326_v9 }
 0x147   : > { %v984_v22 = vpop.permute.xlu0 %983 }
 0x148   : > { %v988_v24 = vsel %vm985_vm15, %v2212_v58, %v984_v22  ;;  %v1501_v25 = vpop.permute.xlu1 %1500 }
 0x149   : > { %v1506_v26 = vsel %vm1504_vm3, %v1499_v20, %v1501_v25  ;;  %2003 = vmatpush3.msk.msra.mxu1 %vm172_vm0, %v988_v24 }
 0x14a   : > { %2005 = vmatmul.mubr.msk.f32.vlgmr.msra.gmra.mrb[8].mxu1 %vm321_vm12, %v1931_v15  ;;  %1940 = vmatmul.mubr.msk.f32.vlgmr.msra.gmra.mrb[0].mxu0 %vm321_vm12, %v1937_v23 }
 0x14b   : > { %1945 = vmatpush1.msk.msra.mxu0 %vm172_vm0, %v1332_v27  ;;  %v1157_v28 = vpop.permute.xlu0 %1156  ;;  %2007 = vmatprep.subr.mxu1 %v2090_v0 }
 0x14c   : > { %1950 = vmatprep.subr.msk.mxu0 %vm172_vm0, %v1506_v26  ;;  %v1161_v29 = vsel %vm1158_vm1, %v2219_v63, %v1157_v28  ;;  %v1330_v30 = vpop.permute.xlu1 %1329  ;;  %2009 = vmatprep.mubr.msk.f32.mxu1 %vm2110_vm10, %v2090_v0 }
 0x14d   : > { %v1334_v31 = vsel %vm1331_vm2, %v1328_v14, %v1330_v30  ;;  %2008 = vmatpush3.msk.msra.mxu1 %vm172_vm0, %v1161_v29  ;;  %1408 = vmatprep.mubr.f32.mxu0 %v2090_v0 }
 0x14e   : > { %2010 = vmatmul.mubr.msk.f32.vlgmr.msra.gmra.mrb[10].mxu1 %vm321_vm12, %v1937_v23  ;;  %2012 = vmatprep.subr.mxu1 %v2090_v0 }
 0x14f   : > { %2013 = vmatpush3.msk.msra.mxu1 %vm172_vm0, %v1334_v31  ;;  %v1497_v32 = vpop.permute.xlu0 %1496  ;;  %2014 = vmatprep.mubr.msk.f32.mxu1 %vm2110_vm10, %v2090_v0 }
 0x150   : > { %v1505_v34 = vsel %vm1504_vm3, %v1497_v32, %v1499_v20  ;;  %v1503_v35 = vpop.permute.xlu1 %1502  ;;  %2017 = vmatprep.subr.mxu1 %v2090_v0 }
 0x151   : > { %v1507_v36 = vsel %vm1504_vm3, %v1501_v25, %v1503_v35 }
 0x152   : > { %1946 = vmatmul.mubr.msk.f32.vlgmr.msra.gmra.mrb[0].mxu0 %vm321_vm12, %v1943_v33  ;;  %2015 = vmatmul.mubr.msk.f32.vlgmr.msra.gmra.mrb[12].mxu1 %vm321_vm12, %v1943_v33 }
 0x153   : > { %1951 = vmatpush1.msk.msra.mxu0 %vm172_vm0, %v1505_v34  ;;  %2018 = vmatpush3.msk.msra.mxu1 %vm172_vm0, %v1507_v36  ;;  %v1672_v37 = vpop.permute.xlu0 %1671 }
 0x154   : > { %v1674_v39 = vpop.permute.xlu1 %1673  ;;  %2019 = vmatprep.mubr.msk.f32.mxu1 %vm2110_vm10, %v2090_v0  ;;  %2022 = vmatprep.subr.mxu1 %v2090_v0 }
 0x155   : > { %v1679_v40 = vsel %vm1677_vm4, %v1672_v37, %v1674_v39  ;;  %1581 = vmatprep.mubr.f32.mxu0 %v2090_v0 }
 0x156   : > { %2020 = vmatmul.mubr.msk.f32.vlgmr.msra.gmra.mrb[14].mxu1 %vm321_vm12, %v1949_v38  ;;  %1956 = vmatprep.subr.msk.mxu0 %vm172_vm0, %v1679_v40 }
 0x157   : > { %v1676_v41 = vpop.permute.xlu0 %1675  ;;  %2024 = vmatprep.mubr.msk.f32.mxu1 %vm2110_vm10, %v2090_v0 }
 0x158   : > { %v1680_v43 = vsel %vm1677_vm4, %v1674_v39, %v1676_v41  ;;  %v1670_v44 = vpop.permute.xlu1 %1669 }
 0x159   : > { %v1678_v45 = vsel %vm1677_vm4, %v1670_v44, %v1672_v37  ;;  %2023 = vmatpush3.msk.msra.mxu1 %vm172_vm0, %v1680_v43 }
 0x15a   : > { %1952 = vmatmul.mubr.msk.f32.vlgmr.msra.gmra.mrb[0].mxu0 %vm321_vm12, %v1949_v38  ;;  %2025 = vmatmul.mubr.msk.f32.vlgmr.msra.gmra.mrb[16].mxu1 %vm321_vm12, %v1955_v42 }
 0x15b   : > { %1957 = vmatpush1.msk.msra.mxu0 %vm172_vm0, %v1678_v45  ;;  %1754 = vmatprep.mubr.f32.mxu0 %v2090_v0 }
 0x162   : > { %1958 = vmatmul.mubr.msk.f32.vlgmr.msra.gmra.mrb[0].mxu0 %vm321_vm12, %v1955_v42 }
 0x168   : > { %v1837_v6 = vpop.permute.xlu0 %1836 }
 0x20a   : > { %v468_v46 = vpop.f32.mrb[0].mxu1 }
 0x20b   : > { %v1986_v47 = vpop.f32.mrb[1].mxu1 }
 0x20e   : > { %v619_v48 = vpop.f32.mrb[2].mxu1 }
 0x20f   : > { %v620_v49 = vadd.f32 %v619_v48, %v468_v46  ;;  %v1991_v50 = vpop.f32.mrb[3].mxu1 }
 0x212   : > { %v789_v51 = vpop.f32.mrb[4].mxu1 }
 0x213   : > { %v795_v52 = vadd.f32 %v789_v51, %v620_v49  ;;  %v1996_v53 = vpop.f32.mrb[5].mxu1 }
 0x216   : > { %v962_v54 = vpop.f32.mrb[6].mxu1 }
 0x217   : > { %v968_v55 = vadd.f32 %v962_v54, %v795_v52  ;;  %v2001_v56 = vpop.f32.mrb[7].mxu1 }
 0x21d   : > { %v1135_v57 = vpop.f32.mrb[8].mxu1 }
 0x21e   : > { %v1141_v58 = vadd.f32 %v1135_v57, %v968_v55  ;;  %v2006_v59 = vpop.f32.mrb[9].mxu1 }
 0x221   : > { %v1308_v60 = vpop.f32.mrb[10].mxu1 }
 0x222   : > { %v1314_v61 = vadd.f32 %v1308_v60, %v1141_v58  ;;  %v2011_v0 = vpop.f32.mrb[11].mxu1 }
 0x225   : > { %v1481_v62 = vpop.f32.mrb[12].mxu1 }
 0x226   : > { %v1487_v63 = vadd.f32 %v1481_v62, %v1314_v61  ;;  %v2016_v1 = vpop.f32.mrb[13].mxu1 }
 0x229   : > { %v1654_v2 = vpop.f32.mrb[14].mxu1 }
 0x22a   : > { %v1660_v3 = vadd.f32 %v1654_v2, %v1487_v63  ;;  %v2021_v4 = vpop.f32.mrb[15].mxu1 }
 0x22d   : > { %v1827_v5 = vpop.f32.mrb[16].mxu1 }
 0x22e   : > { %v1833_v7 = vadd.f32 %v1827_v5, %v1660_v3  ;;  %v2026_v8 = vpop.f32.mrb[17].mxu1 }
 0x230   : > { %v1841_v9 = vadd.f32 %v1837_v6, %v1833_v7 }
 0x232   : > { %1844 = vst [vmem:[%s170_s15 + $0x10] sm:$0xff] %v1841_v9 }
 0x235   : > { %v1756_v10 = vpop.f32.mrb[0].mxu0 }
 0x236   : > { %v1839_v11 = vadd.f32 %v1837_v6, %v1756_v10  ;;  %v1758_v12 = vpop.f32.mrb[1].mxu0 }
 0x237   : > { %v1840_v13 = vadd.f32 %v1837_v6, %v1758_v12 }
 0x238   : > { %1842 = vst [vmem:[%s170_s15] sm:$0xff] %v1839_v11 }
 0x239   : > { %1843 = vst [vmem:[%s170_s15 + $0x8] sm:$0xff] %v1840_v13 }
 0x23a PF: > { %s13_s12 = sadd.s32 1, %s2088_s12  }
 0x23b   : > { %p10_p4 = scmp.ge.s32.totalorder %s13_s12, 4  }
 0x23d   :  { %12 = sbr.rel (!%p10_p4) target bundleno = 1 (0x1), region = 70 }

</bundles_post_ra>
